<compile_context>
chip_gen: v7x
topology: tpu7x:2x2x1
jax: 0.10.0
libtpu: 0.0.40
codegen_flags: <defaults>
</compile_context>

<pallas_src>
import functools

import jax
import jax.numpy as jnp
from jax import lax
from jax.experimental import pallas as pl
from jax.experimental.pallas import tpu as pltpu


def _cross_entropy_kernel(x_ref, t_ref, o_ref, m_sc, l_sc, s_sc, *,
                          n_rows, n_cols, tile_rows, tile_cols):
    """One (row-tile, class-tile) step.

    x_ref: (TN, TC) logits slab (native dtype), t_ref: (TN, 1) int32 targets,
    o_ref: (1, 8, 128) f32 partial-sum block (resident across the class axis),
    m_sc/l_sc/s_sc: (TN, 1) f32 running max / exp-sum / target-logit scratch.
    """
    i = pl.program_id(0)          # row tile
    j = pl.program_id(1)          # class tile (reduction axis, "arbitrary")
    nj = pl.num_programs(1)

    @pl.when(j == 0)
    def _():
        m_sc[...] = jnp.full_like(m_sc, -jnp.inf)
        l_sc[...] = jnp.zeros_like(l_sc)
        s_sc[...] = jnp.zeros_like(s_sc)

    xn = x_ref[...]                                               # (TN, TC) native dtype
    t = t_ref[...]                                                # (TN, 1) int32

    # Global class indices of this tile; mask the ragged class tail.
    cls = j * tile_cols + lax.broadcasted_iota(
        jnp.int32, (tile_rows, tile_cols), 1)                     # (TN, TC)
    class_ok = cls < n_cols

    # Max and target select in native dtype (exact for bf16); keeps the
    # compare/select/max path cheap on bf16-VPU chips (v6e/v7x).
    neg_inf = jnp.array(-jnp.inf, dtype=xn.dtype)
    x_m = jnp.where(class_ok, xn, neg_inf)                        # (TN, TC)
    tile_max = jnp.max(x_m, axis=1, keepdims=True).astype(jnp.float32)

    m_prev = m_sc[...]                                            # (TN, 1) f32
    m_new = jnp.maximum(m_prev, tile_max)

    # exp / LSE accumulation in f32 (accuracy for large C).
    p = jnp.exp(x_m.astype(jnp.float32) - m_new)                  # masked lanes -> exp(-inf)=0
    alpha = jnp.exp(m_prev - m_new)                               # 0 at j == 0 (m_prev = -inf)
    l_sc[...] = alpha * l_sc[...] + jnp.sum(p, axis=1, keepdims=True)

    # Running target-logit accumulator (exactly one lane over all class tiles;
    # padded class lanes can never match a valid target, so no extra mask).
    s_sc[...] = s_sc[...] + jnp.sum(
        jnp.where(cls == t, xn, jnp.zeros_like(xn)),
        axis=1, keepdims=True).astype(jnp.float32)

    m_sc[...] = m_new

    @pl.when(j == nj - 1)
    def _():
        # Mask padded rows of the (possibly ragged) last row tile.
        row_idx = i * tile_rows + lax.broadcasted_iota(
            jnp.int32, (tile_rows, 1), 0)
        valid = row_idx < n_rows                                  # (TN, 1)
        # Per-row -log softmax(x)[target] = (m + log l) - x[target].
        nll = jnp.where(valid, (m_sc[...] + jnp.log(l_sc[...])) - s_sc[...], 0.0)
        partial = jnp.sum(nll)                                    # scalar
        # Lane-dense aligned (8,128) store: partial at [0,0,0], zeros elsewhere.
        sub = lax.broadcasted_iota(jnp.int32, (1, 8, 128), 1)
        lane = lax.broadcasted_iota(jnp.int32, (1, 8, 128), 2)
        o_ref[...] = jnp.where((sub == 0) & (lane == 0), partial, 0.0)


def _vmem_params():
    """(tile_budget_bytes, vmem_limit_bytes), generation-aware."""
    try:
        cap = int(pltpu.get_tpu_info().vmem_capacity_bytes)
    except Exception:
        cap = 64 * 1024 * 1024  # conservative fallback (v7x per-TC size)
    if cap <= 64 * 1024 * 1024:
        # v7x: 64 MiB physical per TensorCore -> leave headroom for the output
        # double-buffer and Mosaic internal scratch.
        return 18 * 1024 * 1024, 40 * 1024 * 1024
    # v5e / v6e: 128 MiB physical -> bigger tiles, fewer grid steps.
    return 44 * 1024 * 1024, 88 * 1024 * 1024


def _pick_tiles(n, c, itemsize, budget):
    """(row_tile, class_tile) fitting `budget`, aligned to (sublane, 128)."""
    sublane = 8 * max(1, 4 // max(1, itemsize))     # 8 for f32, 16 for bf16
    per_elem = 2 * itemsize + 16                    # 2x-buffered input + f32 temps

    # Class tile: full C when it fits comfortably with at least `sublane`
    # rows, else a lane-aligned slice (the online LSE handles the rest).
    tc_budget = max(128, (budget // (sublane * per_elem)) // 128 * 128)
    tc_cap = min(8 * 1024, tc_budget)
    tc = c if c <= tc_cap else tc_cap

    # Row tile: largest sublane-aligned count fitting the budget.
    tn = budget // max(1, tc * per_elem)
    tn = max(sublane, min(int(tn), 1024))
    if tn >= n:
        if n >= 2 * sublane:
            # Force >=2 row tiles so the "parallel" axis can shard across the
            # two TensorCores on v7x (negligible cost on 1-TC chips).
            half = (n + 1) // 2
            tn = ((half + sublane - 1) // sublane) * sublane
        else:
            tn = n
    else:
        tn = max(sublane, (tn // sublane) * sublane)
    return tn, tc


def cross_entropy(logits, target):
    """logits: (N, C) float array (f32 or bf16); target: (N,) integer class ids.

    Returns scalar f32 loss = -mean_i log softmax(logits)_i[target_i].
    """
    n, c = logits.shape
    t2d = target.astype(jnp.int32).reshape(n, 1)

    itemsize = jnp.dtype(logits.dtype).itemsize
    budget, vmem_limit = _vmem_params()
    tn, tc = _pick_tiles(n, c, itemsize, budget)
    num_row_tiles = pl.cdiv(n, tn)
    num_cls_tiles = pl.cdiv(c, tc)

    kernel = functools.partial(
        _cross_entropy_kernel,
        n_rows=n, n_cols=c, tile_rows=tn, tile_cols=tc)

    partials = pl.pallas_call(
        kernel,
        out_shape=jax.ShapeDtypeStruct((num_row_tiles, 8, 128), jnp.float32),
        grid=(num_row_tiles, num_cls_tiles),
        in_specs=[
            pl.BlockSpec((tn, tc), lambda i, j: (i, j)),
            pl.BlockSpec((tn, 1), lambda i, j: (i, 0)),
        ],
        out_specs=pl.BlockSpec((1, 8, 128), lambda i, j: (i, 0, 0)),
        scratch_shapes=[
            pltpu.VMEM((tn, 1), jnp.float32),   # running max
            pltpu.VMEM((tn, 1), jnp.float32),   # running exp-sum
            pltpu.VMEM((tn, 1), jnp.float32),   # running target logit
        ],
        compiler_params=pltpu.CompilerParams(
            dimension_semantics=("parallel", "arbitrary"),
            vmem_limit_bytes=vmem_limit,
        ),
        cost_estimate=pl.CostEstimate(
            flops=5 * n * c,
            transcendentals=n * c,
            bytes_accessed=n * c * itemsize + n * 4
            + num_row_tiles * 8 * 128 * 4,
        ),
    )(logits, t2d)

    # Tiny epilogue: sum per-tile partial NLL sums, mean over the true N.
    return jnp.sum(partials) / n


if __name__ == "__main__":
    key = jax.random.PRNGKey(0)
    kx, kt = jax.random.split(key)

    N, C = 8, 32  # batch of 8 samples, 32 classes
    x = jax.random.normal(kx, (N, C), dtype=jnp.float32)
    target = jax.random.randint(kt, (N,), 0, C, dtype=jnp.int32)

    loss = cross_entropy(x, target)
    jax.block_until_ready(loss)

    # Reference check in plain JAX (same math as the PyTorch module).
    logp = jax.nn.log_softmax(x, axis=1)
    ref = -jnp.mean(logp[jnp.arange(N), target])
    assert jnp.allclose(loss, ref, atol=1e-5, rtol=1e-5), (loss, ref)

    print("KERNEL_OK")
</pallas_src>

<mosaic_0001>
module attributes {stable_mosaic.version = 11 : i64} {
  func.func @_cross_entropy_kernel(%arg0: i32, %arg1: i32, %arg2: memref<8x32xf32, #tpu.memory_space<vmem>>, %arg3: memref<8x1xi32, #tpu.memory_space<vmem>>, %arg4: memref<1x8x128xf32, #tpu.memory_space<vmem>>, %arg5: memref<8x1xf32, #tpu.memory_space<vmem>>, %arg6: memref<8x1xf32, #tpu.memory_space<vmem>>, %arg7: memref<8x1xf32, #tpu.memory_space<vmem>>) attributes {dimension_semantics = [#tpu.dimension_semantics<parallel>, #tpu.dimension_semantics<arbitrary>], iteration_bounds = array<i64: 1, 1>, scalar_prefetch = 0 : i64, scratch_operands = 3 : i64, tpu.core_type = #tpu.core_type<tc>, window_params = [{transform_indices = @transform_0, window_bounds = array<i64: 8, 32>}, {transform_indices = @transform_1, window_bounds = array<i64: 8, 1>}, {transform_indices = @transform_2, window_bounds = array<i64: 1, 8, 128>}]} {
    %c0_i32 = arith.constant 0 : i32
    %0 = arith.cmpi eq, %arg1, %c0_i32 : i32
    %1 = arith.extui %0 : i1 to i32
    %c0_i32_0 = arith.constant 0 : i32
    %2 = arith.cmpi ne, %1, %c0_i32_0 : i32
    scf.if %2 {
      %cst_23 = arith.constant 0xFF800000 : f32
      %41 = vector.broadcast %cst_23 : f32 to vector<8x1xf32>
      %c0_24 = arith.constant 0 : index
      %c0_25 = arith.constant 0 : index
      %42 = vector.load %arg5[%c0_24, %c0_25] : memref<8x1xf32, #tpu.memory_space<vmem>>, vector<8x1xf32>
      tpu.vector_store %arg5[%c0_24, %c0_25], %41 {strides = array<i32>} : memref<8x1xf32, #tpu.memory_space<vmem>>, vector<8x1xf32>,
      %cst_26 = arith.constant 0.000000e+00 : f32
      %43 = vector.broadcast %cst_26 : f32 to vector<8x1xf32>
      %c0_27 = arith.constant 0 : index
      %c0_28 = arith.constant 0 : index
      %44 = vector.load %arg6[%c0_27, %c0_28] : memref<8x1xf32, #tpu.memory_space<vmem>>, vector<8x1xf32>
      tpu.vector_store %arg6[%c0_27, %c0_28], %43 {strides = array<i32>} : memref<8x1xf32, #tpu.memory_space<vmem>>, vector<8x1xf32>,
      %cst_29 = arith.constant 0.000000e+00 : f32
      %45 = vector.broadcast %cst_29 : f32 to vector<8x1xf32>
      %c0_30 = arith.constant 0 : index
      %c0_31 = arith.constant 0 : index
      %46 = vector.load %arg7[%c0_30, %c0_31] : memref<8x1xf32, #tpu.memory_space<vmem>>, vector<8x1xf32>
      tpu.vector_store %arg7[%c0_30, %c0_31], %45 {strides = array<i32>} : memref<8x1xf32, #tpu.memory_space<vmem>>, vector<8x1xf32>,
    } else {
    }
    %c0 = arith.constant 0 : index
    %c0_1 = arith.constant 0 : index
    %3 = vector.load %arg2[%c0, %c0_1] : memref<8x32xf32, #tpu.memory_space<vmem>>, vector<8x32xf32>
    %c0_2 = arith.constant 0 : index
    %c0_3 = arith.constant 0 : index
    %4 = vector.load %arg3[%c0_2, %c0_3] : memref<8x1xi32, #tpu.memory_space<vmem>>, vector<8x1xi32>
    %c32_i32 = arith.constant 32 : i32
    %5 = arith.muli %arg1, %c32_i32 : i32
    %6 = tpu.iota {dimensions = array<i32: 1>} : vector<8x32xi32>
    %7 = vector.broadcast %5 : i32 to vector<8x32xi32>
    %8 = arith.addi %7, %6 : vector<8x32xi32>
    %c32_i32_4 = arith.constant 32 : i32
    %9 = vector.broadcast %c32_i32_4 : i32 to vector<8x32xi32>
    %10 = arith.cmpi slt, %8, %9 : vector<8x32xi32>
    %cst = arith.constant 0xFF800000 : f32
    %11 = vector.broadcast %cst : f32 to vector<8x32xf32>
    %12 = arith.select %10, %3, %11 : vector<8x32xi1>, vector<8x32xf32>
    %cst_5 = arith.constant dense<0xFF800000> : vector<8xf32>
    %13 = vector.multi_reduction <maximumf>, %12, %cst_5 [1] : vector<8x32xf32> to vector<8xf32>
    %14 = vector.shape_cast %13 : vector<8xf32> to vector<8x1xf32>
    %c0_6 = arith.constant 0 : index
    %c0_7 = arith.constant 0 : index
    %15 = vector.load %arg5[%c0_6, %c0_7] : memref<8x1xf32, #tpu.memory_space<vmem>>, vector<8x1xf32>
    %16 = arith.maximumf %15, %14 : vector<8x1xf32>
    %17 = vector.broadcast %16 : vector<8x1xf32> to vector<8x32xf32>
    %18 = arith.subf %12, %17 : vector<8x32xf32>
    %19 = math.exp %18 : vector<8x32xf32>
    %20 = arith.subf %15, %16 : vector<8x1xf32>
    %21 = math.exp %20 : vector<8x1xf32>
    %c0_8 = arith.constant 0 : index
    %c0_9 = arith.constant 0 : index
    %22 = vector.load %arg6[%c0_8, %c0_9] : memref<8x1xf32, #tpu.memory_space<vmem>>, vector<8x1xf32>
    %23 = arith.mulf %21, %22 : vector<8x1xf32>
    %cst_10 = arith.constant dense<0.000000e+00> : vector<8xf32>
    %24 = vector.multi_reduction <add>, %19, %cst_10 [1] : vector<8x32xf32> to vector<8xf32>
    %25 = vector.shape_cast %24 : vector<8xf32> to vector<8x1xf32>
    %26 = arith.addf %23, %25 : vector<8x1xf32>
    %c0_11 = arith.constant 0 : index
    %c0_12 = arith.constant 0 : index
    %27 = vector.load %arg6[%c0_11, %c0_12] : memref<8x1xf32, #tpu.memory_space<vmem>>, vector<8x1xf32>
    tpu.vector_store %arg6[%c0_11, %c0_12], %26 {strides = array<i32>} : memref<8x1xf32, #tpu.memory_space<vmem>>, vector<8x1xf32>,
    %c0_13 = arith.constant 0 : index
    %c0_14 = arith.constant 0 : index
    %28 = vector.load %arg7[%c0_13, %c0_14] : memref<8x1xf32, #tpu.memory_space<vmem>>, vector<8x1xf32>
    %29 = vector.broadcast %4 : vector<8x1xi32> to vector<8x32xi32>
    %30 = arith.cmpi eq, %8, %29 : vector<8x32xi32>
    %cst_15 = arith.constant 0.000000e+00 : f32
    %31 = vector.broadcast %cst_15 : f32 to vector<8x32xf32>
    %32 = arith.select %30, %3, %31 : vector<8x32xi1>, vector<8x32xf32>
    %cst_16 = arith.constant dense<0.000000e+00> : vector<8xf32>
    %33 = vector.multi_reduction <add>, %32, %cst_16 [1] : vector<8x32xf32> to vector<8xf32>
    %34 = vector.shape_cast %33 : vector<8xf32> to vector<8x1xf32>
    %35 = arith.addf %28, %34 : vector<8x1xf32>
    %c0_17 = arith.constant 0 : index
    %c0_18 = arith.constant 0 : index
    %36 = vector.load %arg7[%c0_17, %c0_18] : memref<8x1xf32, #tpu.memory_space<vmem>>, vector<8x1xf32>
    tpu.vector_store %arg7[%c0_17, %c0_18], %35 {strides = array<i32>} : memref<8x1xf32, #tpu.memory_space<vmem>>, vector<8x1xf32>,
    %c0_19 = arith.constant 0 : index
    %c0_20 = arith.constant 0 : index
    %37 = vector.load %arg5[%c0_19, %c0_20] : memref<8x1xf32, #tpu.memory_space<vmem>>, vector<8x1xf32>
    tpu.vector_store %arg5[%c0_19, %c0_20], %16 {strides = array<i32>} : memref<8x1xf32, #tpu.memory_space<vmem>>, vector<8x1xf32>,
    %c0_i32_21 = arith.constant 0 : i32
    %38 = arith.cmpi eq, %arg1, %c0_i32_21 : i32
    %39 = arith.extui %38 : i1 to i32
    %c0_i32_22 = arith.constant 0 : i32
    %40 = arith.cmpi ne, %39, %c0_i32_22 : i32
    scf.if %40 {
      %c8_i32 = arith.constant 8 : i32
      %41 = arith.muli %arg0, %c8_i32 : i32
      %42 = tpu.iota {dimensions = array<i32: 0>} : vector<8x1xi32>
      %43 = vector.broadcast %41 : i32 to vector<8x1xi32>
      %44 = arith.addi %43, %42 : vector<8x1xi32>
      %c8_i32_23 = arith.constant 8 : i32
      %45 = vector.broadcast %c8_i32_23 : i32 to vector<8x1xi32>
      %46 = arith.cmpi slt, %44, %45 : vector<8x1xi32>
      %c0_24 = arith.constant 0 : index
      %c0_25 = arith.constant 0 : index
      %47 = vector.load %arg5[%c0_24, %c0_25] : memref<8x1xf32, #tpu.memory_space<vmem>>, vector<8x1xf32>
      %c0_26 = arith.constant 0 : index
      %c0_27 = arith.constant 0 : index
      %48 = vector.load %arg6[%c0_26, %c0_27] : memref<8x1xf32, #tpu.memory_space<vmem>>, vector<8x1xf32>
      %49 = math.log %48 : vector<8x1xf32>
      %50 = arith.addf %47, %49 : vector<8x1xf32>
      %c0_28 = arith.constant 0 : index
      %c0_29 = arith.constant 0 : index
      %51 = vector.load %arg7[%c0_28, %c0_29] : memref<8x1xf32, #tpu.memory_space<vmem>>, vector<8x1xf32>
      %52 = arith.subf %50, %51 : vector<8x1xf32>
      %cst_30 = arith.constant 0.000000e+00 : f32
      %53 = vector.broadcast %cst_30 : f32 to vector<8x1xf32>
      %54 = arith.select %46, %52, %53 : vector<8x1xi1>, vector<8x1xf32>
      %55 = vector.shape_cast %54 : vector<8x1xf32> to vector<1x8x1xf32>
      %cst_31 = arith.constant dense<0.000000e+00> : vector<1xf32>
      %56 = vector.multi_reduction <add>, %55, %cst_31 [1, 2] : vector<1x8x1xf32> to vector<1xf32>
      %57 = vector.shape_cast %56 : vector<1xf32> to vector<1x1x1xf32>
      %58 = vector.extract %57[0, 0, 0] : f32 from vector<1x1x1xf32>
      %59 = tpu.iota {dimensions = array<i32: 1>} : vector<1x8x128xi32>
      %60 = tpu.iota {dimensions = array<i32: 2>} : vector<1x8x128xi32>
      %c0_i32_32 = arith.constant 0 : i32
      %61 = vector.broadcast %c0_i32_32 : i32 to vector<1x8x128xi32>
      %62 = arith.cmpi eq, %59, %61 : vector<1x8x128xi32>
      %c0_i32_33 = arith.constant 0 : i32
      %63 = vector.broadcast %c0_i32_33 : i32 to vector<1x8x128xi32>
      %64 = arith.cmpi eq, %60, %63 : vector<1x8x128xi32>
      %65 = arith.andi %62, %64 : vector<1x8x128xi1>
      %cst_34 = arith.constant 0.000000e+00 : f32
      %66 = vector.broadcast %58 : f32 to vector<1x8x128xf32>
      %67 = vector.broadcast %cst_34 : f32 to vector<1x8x128xf32>
      %68 = arith.select %65, %66, %67 : vector<1x8x128xi1>, vector<1x8x128xf32>
      %c0_35 = arith.constant 0 : index
      %c0_36 = arith.constant 0 : index
      %c0_37 = arith.constant 0 : index
      %69 = vector.load %arg4[%c0_35, %c0_36, %c0_37] : memref<1x8x128xf32, #tpu.memory_space<vmem>>, vector<1x8x128xf32>
      tpu.vector_store %arg4[%c0_35, %c0_36, %c0_37], %68 {strides = array<i32>} : memref<1x8x128xf32, #tpu.memory_space<vmem>>, vector<1x8x128xf32>,
    } else {
    }
    return
  }
  func.func @transform_0(%arg0: i32, %arg1: i32) -> (i32, i32) {
    %c0_i32 = arith.constant 0 : i32
    return %arg0, %arg1 : i32, i32
  }
  func.func @transform_1(%arg0: i32, %arg1: i32) -> (i32, i32) {
    %c0_i32 = arith.constant 0 : i32
    %c0_i32_0 = arith.constant 0 : i32
    return %arg0, %c0_i32 : i32, i32
  }
  func.func @transform_2(%arg0: i32, %arg1: i32) -> (i32, i32, i32) {
    %c0_i32 = arith.constant 0 : i32
    %c0_i32_0 = arith.constant 0 : i32
    %c0_i32_1 = arith.constant 0 : i32
    return %arg0, %c0_i32, %c0_i32_0 : i32, i32, i32
  }
}

</mosaic_0001>

<bundles_post_ra>
// kernel: tpu_custom_call.1
= control target key start
LH: loop header
LB: loop body
LE: loop exit
PB: predicated region body
PF: predicated region fallthrough
CT: control target
= control target key end

     0   :  { %v23_v0 = vlaneseq  ;;  %s205_s0 = inlined_call_operand.vmem [shape: f32[8,32], index: 0, kind: input, shape index: {}]   ;;  %s206_s1 = inlined_call_operand.vmem [shape: s32[8,1], index: 1, kind: input, shape index: {}]   ;;  %s207_s2 = inlined_call_operand.hbm [shape: f32[1,8,128], index: 2, kind: output, shape index: {}]  }
   0x1   :  { %7 = vsyncpa [#allocation6], 0  ;;  %v20_v1 = vld [vmem:[%s205_s0] sm:$0xff]  ;;  %vm29_vm0 = vcmask 261120   ;;  %vm16_vm2 = vcmask 7168   ;;  %v151_v5 = vmov -inf  }
   0x2   :  { %v174_v2 = vand.u32 127, %v23_v0  ;;  %17 = vst.msk [vmem:[#allocation2] sm:$0xff] %vm16_vm2, %v151_v5  ;;  %v152_v6 = vmov 0   ;;  %v21_v7 = vld [vmem:[%s206_s1] sm:$0xff]  ;;  %v153_v8 = vmov 0.0   ;;  %v71_v45 = vshrl.u32 %v23_v0, 7 }
   0x3   :  { %119 = vset.pattern.permute.xlu0 %v152_v6  ;;  %120 = vset.pattern.permute.xlu1 %v152_v6  ;;  %18 = vst.msk [vmem:[#allocation3] sm:$0xff] %vm16_vm2, %v153_v8  ;;  %19 = vst.msk [vmem:[#allocation4] sm:$0xff] %vm16_vm2, %v153_v8  ;;  %s154_s0 = smov [#allocation5]  }
   0x4   :  { %vm27_vm1 = vcmp.lt.s32.totalorder %v174_v2, 32  ;;  %56 = vperm.xlu1 %120, %v21_v7   ;;  %vm93_vm4 = vcmp.eq.s32.totalorder %v71_v45, 0  ;;  %vm94_vm5 = vcmp.eq.s32.totalorder %v174_v2, 0  ;;  %s105_s1 = sshll.u32 %s154_s0, 4  ;;  %s106_s1 = int_to_ptr.vmem [resolvable:$true] %s105_s1 }
   0x5   :  { %v28_v3 = vsel %vm27_vm1, %v20_v1, -inf  ;;  %vm95_vm6 = vmand %vm93_vm4, %vm94_vm5  ;;  %s127_s14 = scalar_lea.vmem %s106_s1, 128  ;;  %p132_p1 = scmp.lt.s32.totalorder %s106_s1, %s106_s1 }
   0x6   :  { %v30_v4 = vsel %vm29_vm0, %v28_v3, -inf  ;;  %p128_p0 = scmp.ne.s32.totalorder %s106_s1, %s127_s14  ;;  %p133_p2 = scmp.lt.s32.totalorder %s127_s14, %s127_s14 }
   0x7   :  { %31 = vmax.xlane.f32.xlu0 %v30_v4 }
   0x8   :  { %p134_p3 = por %p133_p2, %p132_p1 }
   0x9   :  { %v33_v9 = vld [vmem:[#allocation2] sm:$0xff] }
   0xa   :  { %v46_v23 = vld [vmem:[#allocation3] sm:$0xff]  ;;  %v54_v27 = vld [vmem:[#allocation4] sm:$0xff]  ;;  %p135_p4 = pnand %p134_p3, %p128_p0 }
  0x83   :  { %v57_v16 = vpop.permute.xlu1 %56 }
  0x84   :  { %vm58_vm3 = vcmp.eq.s32.totalorder %v174_v2, %v57_v16 }
  0x85   :  { %v59_v18 = vsel %vm58_vm3, %v20_v1, 0.0 }
  0x86   :  { %v60_v20 = vsel %vm29_vm0, %v59_v18, 0.0 }
  0x94   :  { %v32_v10 = vpop.xlane.xlu0 %31 }
  0x95   :  { %v34_v11 = vmax.f32 %v33_v9, %v32_v10 }
  0x97   :  { %v43_v12 = vsub.f32 %v33_v9, %v34_v11  ;;  %65 = vst.msk [vmem:[#allocation2] sm:$0xff] %vm16_vm2, %v34_v11  ;;  %37 = vperm.xlu0 %119, %v34_v11  }
  0x99   :  { %v44_v21 = vmul.f32 1.442695, %v43_v12 }
  0x9e   :  { %v75_v33 = vld [vmem:[#allocation2] sm:$0xff] }
 0x116   :  { %v38_v13 = vpop.permute.xlu0 %37 }
 0x117   :  { %v40_v14 = vsub.f32 %v28_v3, %v38_v13 }
 0x119   :  { %v41_v15 = vmul.f32 1.442695, %v40_v14 }
 0x11b   :  { %121 = vpow2.f32 %v41_v15 }
 0x11c   :  { %123 = vpow2.f32 %v44_v21 }
 0x125   :  { %v122_v17 = vpop.eup %121 }
 0x126   :  { %v48_v19 = vsel %vm29_vm0, %v122_v17, 0.0  ;;  %v124_v22 = vpop.eup %123 }
 0x127   :  { %49 = vadd.xlane.f32.xlu1 %v48_v19  ;;  %v47_v24 = vmul.f32 %v124_v22, %v46_v23 }
 0x12b   :  { %61 = vadd.xlane.f32.xlu1 %v60_v20 }
 0x1b4   :  { %v50_v25 = vpop.xlane.xlu1 %49 }
 0x1b5   :  { %v51_v26 = vadd.f32 %v50_v25, %v47_v24 }
 0x1b7   :  { %53 = vst.msk [vmem:[#allocation3] sm:$0xff] %vm16_vm2, %v51_v26 }
 0x1b8   :  { %v62_v28 = vpop.xlane.xlu1 %61 }
 0x1b9   :  { %v63_v29 = vadd.f32 %v62_v28, %v54_v27 }
 0x1bb   :  { %64 = vst.msk [vmem:[#allocation4] sm:$0xff] %vm16_vm2, %v63_v29 }
 0x1be   :  { %v76_v30 = vld [vmem:[#allocation3] sm:$0xff] }
 0x1bf   :  { %125 = vlog2.f32 %v76_v30 }
 0x1c2   :  { %v80_v34 = vld [vmem:[#allocation4] sm:$0xff] }
 0x1c9   :  { %v126_v31 = vpop.eup %125 }
 0x1ca   :  { %v78_v32 = vmul.f32 0.6931472, %v126_v31 }
 0x1cc   :  { %v79_v35 = vadd.f32 %v78_v32, %v75_v33 }
 0x1ce   :  { %v81_v36 = vsub.f32 %v79_v35, %v80_v34 }
 0x1d0   :  { %v83_v37 = vsel %vm16_vm2, %v81_v36, 0.0 }
 0x1d1   :  { %84 = vadd.xlane.f32.xlu1 %v83_v37 }
 0x25e   :  { %v85_v38 = vpop.xlane.xlu1 %84 }
 0x25f   :  { %v86_v39 = vrot.slane %v85_v38, 4 }
 0x261   :  { %v87_v40 = vadd.f32 %v86_v39, %v85_v38 }
 0x263   :  { %v88_v41 = vrot.slane %v87_v40, 2 }
 0x265   :  { %v89_v42 = vadd.f32 %v88_v41, %v87_v40 }
 0x267   :  { %v90_v43 = vrot.slane %v89_v42, 1 }
 0x269   :  { %v91_v44 = vadd.f32 %v90_v43, %v89_v42 }
 0x26b   :  { %113 = vpush %v91_v44 }
 0x29c   :  { %s114_s13 = spop %113 }
 0x29d   :  { %v96_v46 = vstv %s114_s13 }
 0x29e   :  { %v97_v47 = vsel %vm95_vm6, %v96_v46, 0.0 }
 0x29f   :  { %98 = vst [vmem:[#allocation5] sm:$0xff] %v97_v47 }
 0x2a0   :  { %138 = shalt.err (!%p135_p4)
}
 0x2a1   :  { %s139_s17 = scalar_lea.hbm %s207_s2, 128 }
 0x2a2   :  { %p140_p5 = scmp.ne.s32.totalorder %s207_s2, %s139_s17  ;;  %p143_p6 = scmp.lt.u32.totalorder %s139_s17, %s207_s2 }
 0x2a4   :  { %p145_p7 = pnand %p143_p6, %p140_p5 }
 0x2a6   :  { %148 = shalt.err (!%p145_p7)
}
 0x2a7   :  { %108 = dma.vmem_to_hbm [thread:$0]  %s106_s1, 128, %s207_s2, [#allocation6]  }
 0x2a8   :  { %149 = dma.done.wait [#allocation6], 128  }
 0x2a9   :  { %150 = vsyncadd [#allocation6], 4294967168 }
 0x2aa   :  { %112 = vsyncpa [#allocation6], 1 }

</bundles_post_ra>
